<compile_context>
chip_gen: v7x
topology: tpu7x:2x2x1
jax: 0.10.0
libtpu: 0.0.40
codegen_flags: <defaults>
</compile_context>

<pallas_src>
import functools

import jax
import jax.numpy as jnp
from jax.experimental import pallas as pl
from jax.experimental.pallas import tpu as pltpu

# ----------------------------------------------------------------------------
# Model configuration (synthetic stand-in, same dataflow as F_Model)
# ----------------------------------------------------------------------------
PATCH = 8          # backbone patch-embed patch size
EMBED_D = 64       # backbone token width
BACKBONE_C = 64    # backbone output feature dim (must be divisible by 4)
NECK_C = 32        # SimpleFPN output channels
NUM_CLASSES = 10   # Cls_Head classes
LANE = 128         # TPU lane width -- all fused GEMMs run 128-wide


def _round_up(x, m):
    return ((x + m - 1) // m) * m


# ----------------------------------------------------------------------------
# The single fused Pallas kernel
# ----------------------------------------------------------------------------
def _fused_kernel(patches_ref, pool_ref,
                  wp_ref, bp_ref, wbb_ref, bbb_ref,
                  wnk_ref, bnk_ref, whd_ref, bhd_ref,
                  out_ref, pooled_acc):
    """Whole forward pass.

    Grid axis 0 tiles the patch rows (reduction axis, 'arbitrary'):
      per step : tok = relu(patch_tile @ Wp + bp)         (TM, 128)   MXU
                 pooled_acc += pool_tile @ tok            (B, 128)    MXU
      last step: feat   = pooled @ Wbb + bbb              (B, 128)    MXU
                 y      = relu(feat @ Wneck_exp + bneck)  (B, 128)    MXU
                 logits = y @ Whead_pool + bhead          (B, 128)    MXU
    All pooling is folded into MXU matmuls; no cross-sublane reductions,
    no reshapes/transposes inside the kernel.
    """
    i = pl.program_id(0)

    @pl.when(i == 0)
    def _():
        pooled_acc[...] = jnp.zeros_like(pooled_acc)

    # Patch embedding (bf16 MXU, f32 accumulate, f32 bias+ReLU epilogue).
    tok = jnp.dot(patches_ref[...], wp_ref[...],
                  preferred_element_type=jnp.float32)
    tok = jnp.maximum(tok + bp_ref[...], 0.0)

    # Per-batch token mean folded into an MXU matmul with the pool matrix.
    pooled_acc[...] += jnp.dot(pool_ref[...], tok.astype(jnp.bfloat16),
                               preferred_element_type=jnp.float32)

    @pl.when(i == pl.num_programs(0) - 1)
    def _():
        pooled = pooled_acc[...]                                      # (B, 128)
        # Backbone projection.
        feat = jnp.dot(pooled.astype(jnp.bfloat16), wbb_ref[...],
                       preferred_element_type=jnp.float32) + bbb_ref[...]
        # SimpleFPN stand-in: 1x1 conv over the 2x2 spatial grid, expressed as
        # a block-diagonal (channel x spatial) weight -> plain GEMM + ReLU.
        y = jnp.dot(feat.astype(jnp.bfloat16), wnk_ref[...],
                    preferred_element_type=jnp.float32) + bnk_ref[...]
        y = jnp.maximum(y, 0.0)
        # Cls_Head stand-in: global-avg-pool folded into the head weight.
        logits = jnp.dot(y.astype(jnp.bfloat16), whd_ref[...],
                         preferred_element_type=jnp.float32) + bhd_ref[...]
        out_ref[...] = logits.astype(out_ref.dtype)


def _fused_pallas(patches, pool_mat, fp, *, tm):
    m_pad, k_pad = patches.shape
    batch = pool_mat.shape[0]
    grid = (m_pad // tm,)
    full = lambda i: (0, 0)   # weights/biases: same block every step -> stay in VMEM

    return pl.pallas_call(
        _fused_kernel,
        out_shape=jax.ShapeDtypeStruct((batch, LANE), jnp.float32),
        grid_spec=pltpu.PrefetchScalarGridSpec(
            num_scalar_prefetch=0,
            grid=grid,
            in_specs=[
                pl.BlockSpec((tm, k_pad), lambda i: (i, 0)),   # patch-row tile
                pl.BlockSpec((batch, tm), lambda i: (0, i)),   # pool-matrix cols
                pl.BlockSpec((k_pad, LANE), full),             # W_patch (bf16)
                pl.BlockSpec((1, LANE), full),                 # b_patch (f32)
                pl.BlockSpec((LANE, LANE), full),              # W_bb    (bf16)
                pl.BlockSpec((1, LANE), full),                 # b_bb    (f32)
                pl.BlockSpec((LANE, LANE), full),              # W_neck expanded
                pl.BlockSpec((1, LANE), full),                 # b_neck expanded
                pl.BlockSpec((LANE, LANE), full),              # W_head (pool folded)
                pl.BlockSpec((1, LANE), full),                 # b_head
            ],
            out_specs=pl.BlockSpec((batch, LANE), full),
            scratch_shapes=[pltpu.VMEM((batch, LANE), jnp.float32)],
        ),
        compiler_params=pltpu.CompilerParams(
            dimension_semantics=("arbitrary",)),
    )(patches, pool_mat, fp["wp"], fp["bp"], fp["wbb"], fp["bbb"],
      fp["wnk"], fp["bnk"], fp["whd"], fp["bhd"])


# ----------------------------------------------------------------------------
# Parameters: raw (for the f32 reference) + fused/padded (for the kernel)
# ----------------------------------------------------------------------------
def init_params(key, in_chans=3):
    patch_dim = in_chans * PATCH * PATCH
    ks = jax.random.split(key, 8)

    def dense(kw, kb, fan_in, fan_out):
        w = jax.random.normal(kw, (fan_in, fan_out), jnp.float32) / jnp.sqrt(
            jnp.float32(fan_in))
        b = 0.01 * jax.random.normal(kb, (fan_out,), jnp.float32)
        return w, b

    p = {}
    p["w_patch"], p["b_patch"] = dense(ks[0], ks[1], patch_dim, EMBED_D)
    p["w_bb"], p["b_bb"] = dense(ks[2], ks[3], EMBED_D, BACKBONE_C)
    p["w_neck"], p["b_neck"] = dense(ks[4], ks[5], BACKBONE_C // 4, NECK_C)
    p["w_head"], p["b_head"] = dense(ks[6], ks[7], NECK_C, NUM_CLASSES)
    return p


def prepare_fused_params(params, in_chans=3):
    """One-time weight padding / expansion so every in-kernel GEMM is a
    lane-dense 128-wide bf16 matmul. Pooling/spatial structure is folded into
    the weights (mean & linear commute; 1x1 conv -> block-diagonal weight)."""
    f32, bf16 = jnp.float32, jnp.bfloat16
    patch_dim = in_chans * PATCH * PATCH
    k_pad = _round_up(patch_dim, LANE)
    spatial = 4                     # the fixed view(b, c/4, 2, 2) -> 2*2
    c_in_neck = BACKBONE_C // 4
    assert NECK_C * spatial <= LANE and BACKBONE_C <= LANE and EMBED_D <= LANE

    # Patch embedding (K padded 192 -> 256, N padded 64 -> 128).
    wp = jnp.zeros((k_pad, LANE), f32).at[:patch_dim, :EMBED_D].set(params["w_patch"])
    bp = jnp.zeros((1, LANE), f32).at[0, :EMBED_D].set(params["b_patch"])

    # Backbone projection (64x64 padded to 128x128).
    wbb = jnp.zeros((LANE, LANE), f32).at[:EMBED_D, :BACKBONE_C].set(params["w_bb"])
    bbb = jnp.zeros((1, LANE), f32).at[0, :BACKBONE_C].set(params["b_bb"])

    # Neck 1x1 conv expanded over the 2x2 spatial positions:
    #   W_exp[c*4+s, o*4+s] = w_neck[c, o]   (block-diagonal in the spatial idx)
    eye_s = jnp.eye(spatial, dtype=f32)
    wnk_e = jnp.einsum("co,st->csot", params["w_neck"], eye_s)
    wnk_e = wnk_e.reshape(c_in_neck * spatial, NECK_C * spatial)
    wnk = jnp.zeros((LANE, LANE), f32).at[:c_in_neck * spatial,
                                          :NECK_C * spatial].set(wnk_e)
    bnk = jnp.zeros((1, LANE), f32).at[0, :NECK_C * spatial].set(
        jnp.repeat(params["b_neck"], spatial))

    # Head with the global-average-pool folded in:
    #   W_hp[o*4+s, k] = w_head[o, k] / 4
    whd_e = jnp.repeat(params["w_head"], spatial, axis=0) / float(spatial)
    whd = jnp.zeros((LANE, LANE), f32).at[:NECK_C * spatial,
                                          :NUM_CLASSES].set(whd_e)
    bhd = jnp.zeros((1, LANE), f32).at[0, :NUM_CLASSES].set(params["b_head"])

    return dict(wp=wp.astype(bf16), bp=bp,
                wbb=wbb.astype(bf16), bbb=bbb,
                wnk=wnk.astype(bf16), bnk=bnk,
                whd=whd.astype(bf16), bhd=bhd)


# ----------------------------------------------------------------------------
# Forward passes
# ----------------------------------------------------------------------------
def f_model_forward(fused_params, image):
    """F_Model forward: backbone -> view(b, c/4, 2, 2) -> neck -> head.
    One fused Pallas kernel does every matmul / pooling / activation."""
    B, Cin, H, W = image.shape
    nh, nw = H // PATCH, W // PATCH
    n_tok = nh * nw
    M = B * n_tok
    patch_dim = Cin * PATCH * PATCH

    # Patchify (layout glue, one reshape+transpose in XLA).
    # TODO(synk): at real image sizes, feed NHWC and gather patch rows via a
    # BlockSpec index_map instead of materializing this transpose in HBM.
    p = image.reshape(B, Cin, nh, PATCH, nw, PATCH)
    p = p.transpose(0, 2, 4, 1, 3, 5).reshape(M, patch_dim)

    # Pad to lane-/sublane-aligned shapes, cast activations to bf16.
    k_pad = _round_up(patch_dim, LANE)
    tm = LANE if M >= LANE else _round_up(M, 8)
    m_pad = _round_up(M, tm)
    patches = jnp.zeros((m_pad, k_pad), jnp.bfloat16)
    patches = patches.at[:M, :patch_dim].set(p.astype(jnp.bfloat16))

    # Per-batch token-mean as an MXU matmul: pool_mat @ relu(tokens).
    row_batch = jnp.arange(m_pad) // n_tok
    valid = jnp.arange(m_pad) < M
    pool = (row_batch[None, :] == jnp.arange(B)[:, None]) & valid[None, :]
    pool_mat = (pool.astype(jnp.float32) / float(n_tok)).astype(jnp.bfloat16)

    logits_pad = _fused_pallas(patches, pool_mat, fused_params, tm=tm)
    return logits_pad[:, :NUM_CLASSES]


def f_model_forward_ref(params, image):
    """Pure-JAX f32 reference with the same synthetic dataflow (for checking)."""
    B, Cin, H, W = image.shape
    nh, nw = H // PATCH, W // PATCH
    p = image.reshape(B, Cin, nh, PATCH, nw, PATCH)
    p = p.transpose(0, 2, 4, 1, 3, 5).reshape(B * nh * nw, -1)
    tok = jnp.maximum(p @ params["w_patch"] + params["b_patch"], 0.0)
    pooled = tok.reshape(B, nh * nw, EMBED_D).mean(axis=1)
    feat = pooled @ params["w_bb"] + params["b_bb"]
    x = feat.reshape(B, BACKBONE_C // 4, 2, 2)                 # view(b, c/4, 2, 2)
    xm = x.reshape(B, BACKBONE_C // 4, 4).transpose(0, 2, 1)   # (B, 4, C/4)
    y = jnp.maximum(xm.reshape(B * 4, -1) @ params["w_neck"] + params["b_neck"], 0.0)
    pooled_h = y.reshape(B, 4, NECK_C).mean(axis=1)            # global avg pool
    return pooled_h @ params["w_head"] + params["b_head"]


# ----------------------------------------------------------------------------
if __name__ == "__main__":
    key = jax.random.PRNGKey(0)
    k_img, k_par = jax.random.split(key)

    B, Cin, H, W = 2, 3, 32, 32                     # small NCHW image
    image = jax.random.normal(k_img, (B, Cin, H, W), dtype=jnp.float32)
    params = init_params(k_par, in_chans=Cin)
    fused = prepare_fused_params(params, in_chans=Cin)   # one-time weight prep

    out = jax.jit(f_model_forward)(fused, image)
    out = jax.block_until_ready(out)

    ref = f_model_forward_ref(params, image)
    assert out.shape == (B, NUM_CLASSES), out.shape
    assert bool(jnp.all(jnp.isfinite(out)))
    max_err = float(jnp.max(jnp.abs(out - ref)))
    assert max_err < 0.1, f"bf16 kernel vs f32 reference mismatch: {max_err}"
    print("KERNEL_OK")
</pallas_src>

<mosaic_0001>
module attributes {stable_mosaic.version = 11 : i64} {
  func.func @_fused_kernel(%arg0: i32, %arg1: memref<32x256xbf16, #tpu.memory_space<vmem>>, %arg2: memref<2x32xbf16, #tpu.memory_space<vmem>>, %arg3: memref<256x128xbf16, #tpu.memory_space<vmem>>, %arg4: memref<1x128xf32, #tpu.memory_space<vmem>>, %arg5: memref<128x128xbf16, #tpu.memory_space<vmem>>, %arg6: memref<1x128xf32, #tpu.memory_space<vmem>>, %arg7: memref<128x128xbf16, #tpu.memory_space<vmem>>, %arg8: memref<1x128xf32, #tpu.memory_space<vmem>>, %arg9: memref<128x128xbf16, #tpu.memory_space<vmem>>, %arg10: memref<1x128xf32, #tpu.memory_space<vmem>>, %arg11: memref<2x128xf32, #tpu.memory_space<vmem>>, %arg12: memref<2x128xf32, #tpu.memory_space<vmem>>) attributes {dimension_semantics = [#tpu.dimension_semantics<arbitrary>], iteration_bounds = array<i64: 1>, scalar_prefetch = 0 : i64, scratch_operands = 1 : i64, tpu.core_type = #tpu.core_type<tc>, window_params = [{transform_indices = @transform_0, window_bounds = array<i64: 32, 256>}, {transform_indices = @transform_1, window_bounds = array<i64: 2, 32>}, {pipeline_mode = #tpu.pipeline_mode<synchronous>, transform_indices = @transform_2, window_bounds = array<i64: 256, 128>}, {pipeline_mode = #tpu.pipeline_mode<synchronous>, transform_indices = @transform_3, window_bounds = array<i64: 1, 128>}, {pipeline_mode = #tpu.pipeline_mode<synchronous>, transform_indices = @transform_4, window_bounds = array<i64: 128, 128>}, {pipeline_mode = #tpu.pipeline_mode<synchronous>, transform_indices = @transform_5, window_bounds = array<i64: 1, 128>}, {pipeline_mode = #tpu.pipeline_mode<synchronous>, transform_indices = @transform_6, window_bounds = array<i64: 128, 128>}, {pipeline_mode = #tpu.pipeline_mode<synchronous>, transform_indices = @transform_7, window_bounds = array<i64: 1, 128>}, {pipeline_mode = #tpu.pipeline_mode<synchronous>, transform_indices = @transform_8, window_bounds = array<i64: 128, 128>}, {pipeline_mode = #tpu.pipeline_mode<synchronous>, transform_indices = @transform_9, window_bounds = array<i64: 1, 128>}, {pipeline_mode = #tpu.pipeline_mode<synchronous>, transform_indices = @transform_10, window_bounds = array<i64: 2, 128>}]} {
    %c0_i32 = arith.constant 0 : i32
    %0 = arith.cmpi eq, %arg0, %c0_i32 : i32
    %1 = arith.extui %0 : i1 to i32
    %c0_i32_0 = arith.constant 0 : i32
    %2 = arith.cmpi ne, %1, %c0_i32_0 : i32
    scf.if %2 {
      %cst_16 = arith.constant 0.000000e+00 : f32
      %20 = vector.broadcast %cst_16 : f32 to vector<2x128xf32>
      %c0_17 = arith.constant 0 : index
      %c0_18 = arith.constant 0 : index
      %21 = vector.load %arg12[%c0_17, %c0_18] : memref<2x128xf32, #tpu.memory_space<vmem>>, vector<2x128xf32>
      tpu.vector_store %arg12[%c0_17, %c0_18], %20 {strides = array<i32>} : memref<2x128xf32, #tpu.memory_space<vmem>>, vector<2x128xf32>,
    } else {
    }
    %c0 = arith.constant 0 : index
    %c0_1 = arith.constant 0 : index
    %3 = vector.load %arg1[%c0, %c0_1] : memref<32x256xbf16, #tpu.memory_space<vmem>>, vector<32x256xbf16>
    %c0_2 = arith.constant 0 : index
    %c0_3 = arith.constant 0 : index
    %4 = vector.load %arg3[%c0_2, %c0_3] : memref<256x128xbf16, #tpu.memory_space<vmem>>, vector<256x128xbf16>
    %cst = arith.constant dense<0.000000e+00> : vector<32x128xf32>
    %5 = tpu.matmul %3, %4, %cst {dimension_numbers = #tpu.dot_dimension_numbers<[1], [0], [0], [1], [0, 0, 1, 1], [], []>} : vector<32x256xbf16>, vector<256x128xbf16>, vector<32x128xf32> -> vector<32x128xf32>
    %c0_4 = arith.constant 0 : index
    %c0_5 = arith.constant 0 : index
    %6 = vector.load %arg4[%c0_4, %c0_5] : memref<1x128xf32, #tpu.memory_space<vmem>>, vector<1x128xf32>
    %7 = vector.broadcast %6 : vector<1x128xf32> to vector<32x128xf32>
    %8 = arith.addf %5, %7 : vector<32x128xf32>
    %cst_6 = arith.constant 0.000000e+00 : f32
    %9 = vector.broadcast %cst_6 : f32 to vector<32x128xf32>
    %10 = arith.maximumf %8, %9 : vector<32x128xf32>
    %c0_7 = arith.constant 0 : index
    %c0_8 = arith.constant 0 : index
    %11 = vector.load %arg12[%c0_7, %c0_8] : memref<2x128xf32, #tpu.memory_space<vmem>>, vector<2x128xf32>
    %c0_9 = arith.constant 0 : index
    %c0_10 = arith.constant 0 : index
    %12 = vector.load %arg2[%c0_9, %c0_10] : memref<2x32xbf16, #tpu.memory_space<vmem>>, vector<2x32xbf16>
    %13 = arith.truncf %10 : vector<32x128xf32> to vector<32x128xbf16>
    %cst_11 = arith.constant dense<0.000000e+00> : vector<2x128xf32>
    %14 = tpu.matmul %12, %13, %cst_11 {dimension_numbers = #tpu.dot_dimension_numbers<[1], [0], [0], [1], [0, 0, 1, 1], [], []>} : vector<2x32xbf16>, vector<32x128xbf16>, vector<2x128xf32> -> vector<2x128xf32>
    %15 = arith.addf %11, %14 : vector<2x128xf32>
    %c0_12 = arith.constant 0 : index
    %c0_13 = arith.constant 0 : index
    %16 = vector.load %arg12[%c0_12, %c0_13] : memref<2x128xf32, #tpu.memory_space<vmem>>, vector<2x128xf32>
    tpu.vector_store %arg12[%c0_12, %c0_13], %15 {strides = array<i32>} : memref<2x128xf32, #tpu.memory_space<vmem>>, vector<2x128xf32>,
    %c0_i32_14 = arith.constant 0 : i32
    %17 = arith.cmpi eq, %arg0, %c0_i32_14 : i32
    %18 = arith.extui %17 : i1 to i32
    %c0_i32_15 = arith.constant 0 : i32
    %19 = arith.cmpi ne, %18, %c0_i32_15 : i32
    scf.if %19 {
      %c0_16 = arith.constant 0 : index
      %c0_17 = arith.constant 0 : index
      %20 = vector.load %arg12[%c0_16, %c0_17] : memref<2x128xf32, #tpu.memory_space<vmem>>, vector<2x128xf32>
      %21 = arith.truncf %20 : vector<2x128xf32> to vector<2x128xbf16>
      %c0_18 = arith.constant 0 : index
      %c0_19 = arith.constant 0 : index
      %22 = vector.load %arg5[%c0_18, %c0_19] : memref<128x128xbf16, #tpu.memory_space<vmem>>, vector<128x128xbf16>
      %cst_20 = arith.constant dense<0.000000e+00> : vector<2x128xf32>
      %23 = tpu.matmul %21, %22, %cst_20 {dimension_numbers = #tpu.dot_dimension_numbers<[1], [0], [0], [1], [0, 0, 1, 1], [], []>} : vector<2x128xbf16>, vector<128x128xbf16>, vector<2x128xf32> -> vector<2x128xf32>
      %c0_21 = arith.constant 0 : index
      %c0_22 = arith.constant 0 : index
      %24 = vector.load %arg6[%c0_21, %c0_22] : memref<1x128xf32, #tpu.memory_space<vmem>>, vector<1x128xf32>
      %25 = vector.broadcast %24 : vector<1x128xf32> to vector<2x128xf32>
      %26 = arith.addf %23, %25 : vector<2x128xf32>
      %27 = arith.truncf %26 : vector<2x128xf32> to vector<2x128xbf16>
      %c0_23 = arith.constant 0 : index
      %c0_24 = arith.constant 0 : index
      %28 = vector.load %arg7[%c0_23, %c0_24] : memref<128x128xbf16, #tpu.memory_space<vmem>>, vector<128x128xbf16>
      %cst_25 = arith.constant dense<0.000000e+00> : vector<2x128xf32>
      %29 = tpu.matmul %27, %28, %cst_25 {dimension_numbers = #tpu.dot_dimension_numbers<[1], [0], [0], [1], [0, 0, 1, 1], [], []>} : vector<2x128xbf16>, vector<128x128xbf16>, vector<2x128xf32> -> vector<2x128xf32>
      %c0_26 = arith.constant 0 : index
      %c0_27 = arith.constant 0 : index
      %30 = vector.load %arg8[%c0_26, %c0_27] : memref<1x128xf32, #tpu.memory_space<vmem>>, vector<1x128xf32>
      %31 = vector.broadcast %30 : vector<1x128xf32> to vector<2x128xf32>
      %32 = arith.addf %29, %31 : vector<2x128xf32>
      %cst_28 = arith.constant 0.000000e+00 : f32
      %33 = vector.broadcast %cst_28 : f32 to vector<2x128xf32>
      %34 = arith.maximumf %32, %33 : vector<2x128xf32>
      %35 = arith.truncf %34 : vector<2x128xf32> to vector<2x128xbf16>
      %c0_29 = arith.constant 0 : index
      %c0_30 = arith.constant 0 : index
      %36 = vector.load %arg9[%c0_29, %c0_30] : memref<128x128xbf16, #tpu.memory_space<vmem>>, vector<128x128xbf16>
      %cst_31 = arith.constant dense<0.000000e+00> : vector<2x128xf32>
      %37 = tpu.matmul %35, %36, %cst_31 {dimension_numbers = #tpu.dot_dimension_numbers<[1], [0], [0], [1], [0, 0, 1, 1], [], []>} : vector<2x128xbf16>, vector<128x128xbf16>, vector<2x128xf32> -> vector<2x128xf32>
      %c0_32 = arith.constant 0 : index
      %c0_33 = arith.constant 0 : index
      %38 = vector.load %arg10[%c0_32, %c0_33] : memref<1x128xf32, #tpu.memory_space<vmem>>, vector<1x128xf32>
      %39 = vector.broadcast %38 : vector<1x128xf32> to vector<2x128xf32>
      %40 = arith.addf %37, %39 : vector<2x128xf32>
      %c0_34 = arith.constant 0 : index
      %c0_35 = arith.constant 0 : index
      %41 = vector.load %arg11[%c0_34, %c0_35] : memref<2x128xf32, #tpu.memory_space<vmem>>, vector<2x128xf32>
      tpu.vector_store %arg11[%c0_34, %c0_35], %40 {strides = array<i32>} : memref<2x128xf32, #tpu.memory_space<vmem>>, vector<2x128xf32>,
    } else {
    }
    return
  }
  func.func @transform_0(%arg0: i32) -> (i32, i32) {
    %c0_i32 = arith.constant 0 : i32
    %c0_i32_0 = arith.constant 0 : i32
    return %arg0, %c0_i32 : i32, i32
  }
  func.func @transform_1(%arg0: i32) -> (i32, i32) {
    %c0_i32 = arith.constant 0 : i32
    %c0_i32_0 = arith.constant 0 : i32
    return %c0_i32, %arg0 : i32, i32
  }
  func.func @transform_2(%arg0: i32) -> (i32, i32) {
    %c0_i32 = arith.constant 0 : i32
    %c0_i32_0 = arith.constant 0 : i32
    %c0_i32_1 = arith.constant 0 : i32
    return %c0_i32, %c0_i32_0 : i32, i32
  }
  func.func @transform_3(%arg0: i32) -> (i32, i32) {
    %c0_i32 = arith.constant 0 : i32
    %c0_i32_0 = arith.constant 0 : i32
    %c0_i32_1 = arith.constant 0 : i32
    return %c0_i32, %c0_i32_0 : i32, i32
  }
  func.func @transform_4(%arg0: i32) -> (i32, i32) {
    %c0_i32 = arith.constant 0 : i32
    %c0_i32_0 = arith.constant 0 : i32
    %c0_i32_1 = arith.constant 0 : i32
    return %c0_i32, %c0_i32_0 : i32, i32
  }
  func.func @transform_5(%arg0: i32) -> (i32, i32) {
    %c0_i32 = arith.constant 0 : i32
    %c0_i32_0 = arith.constant 0 : i32
    %c0_i32_1 = arith.constant 0 : i32
    return %c0_i32, %c0_i32_0 : i32, i32
  }
  func.func @transform_6(%arg0: i32) -> (i32, i32) {
    %c0_i32 = arith.constant 0 : i32
    %c0_i32_0 = arith.constant 0 : i32
    %c0_i32_1 = arith.constant 0 : i32
    return %c0_i32, %c0_i32_0 : i32, i32
  }
  func.func @transform_7(%arg0: i32) -> (i32, i32) {
    %c0_i32 = arith.constant 0 : i32
    %c0_i32_0 = arith.constant 0 : i32
    %c0_i32_1 = arith.constant 0 : i32
    return %c0_i32, %c0_i32_0 : i32, i32
  }
  func.func @transform_8(%arg0: i32) -> (i32, i32) {
    %c0_i32 = arith.constant 0 : i32
    %c0_i32_0 = arith.constant 0 : i32
    %c0_i32_1 = arith.constant 0 : i32
    return %c0_i32, %c0_i32_0 : i32, i32
  }
  func.func @transform_9(%arg0: i32) -> (i32, i32) {
    %c0_i32 = arith.constant 0 : i32
    %c0_i32_0 = arith.constant 0 : i32
    %c0_i32_1 = arith.constant 0 : i32
    return %c0_i32, %c0_i32_0 : i32, i32
  }
  func.func @transform_10(%arg0: i32) -> (i32, i32) {
    %c0_i32 = arith.constant 0 : i32
    %c0_i32_0 = arith.constant 0 : i32
    %c0_i32_1 = arith.constant 0 : i32
    return %c0_i32, %c0_i32_0 : i32, i32
  }
}

</mosaic_0001>

<bundles_post_ra>
// kernel: f_model_forward.1
= control target key start
LH: loop header
LB: loop body
LE: loop exit
PB: predicated region body
PF: predicated region fallthrough
CT: control target
= control target key end

     0   :  { %s1160_s0 = inlined_call_operand.vmem [shape: bf16[32,256], index: 0, kind: input, shape index: {}]   ;;  %s1161_s1 = inlined_call_operand.vmem [shape: bf16[2,32], index: 1, kind: input, shape index: {}]   ;;  %s1162_s2 = inlined_call_operand.vmem [shape: bf16[256,128], index: 2, kind: input, shape index: {}]   ;;  %s1163_s3 = inlined_call_operand.vmem [shape: f32[1,128], index: 3, kind: input, shape index: {}]   ;;  %s1164_s4 = inlined_call_operand.vmem [shape: bf16[128,128], index: 4, kind: input, shape index: {}]   ;;  %s1165_s5 = inlined_call_operand.vmem [shape: f32[1,128], index: 5, kind: input, shape index: {}]   ;;  %s1166_s6 = inlined_call_operand.vmem [shape: bf16[128,128], index: 6, kind: input, shape index: {}]   ;;  %s1167_s7 = inlined_call_operand.vmem [shape: f32[1,128], index: 7, kind: input, shape index: {}]   ;;  %s1168_s8 = inlined_call_operand.vmem [shape: bf16[128,128], index: 8, kind: input, shape index: {}]   ;;  %s1169_s9 = inlined_call_operand.vmem [shape: f32[1,128], index: 9, kind: input, shape index: {}]   ;;  %s1170_s10 = inlined_call_operand.hbm [shape: f32[2,128], index: 10, kind: output, shape index: {}]  }
   0x1   :  { %v838_v0 = vld [vmem:[%s1162_s2 + $0x40] sm:$0xff]   ;;  %v840_v2 = vld [vmem:[%s1162_s2 + $0x48] sm:$0xff]   ;;  %v842_v4 = vld [vmem:[%s1162_s2 + $0x50] sm:$0xff]  }
   0x2   :  { %v839_v1 = vld [vmem:[%s1162_s2] sm:$0xff]   ;;  %709 = vmatprep.subr.bf16.mxu0 %v838_v0  ;;  %v841_v3 = vld [vmem:[%s1162_s2 + $0x8] sm:$0xff]   ;;  %v843_v5 = vld [vmem:[%s1162_s2 + $0x10] sm:$0xff]  }
   0x3   :  { %710 = vmatpush3.bf16.msra.mxu0 %v839_v1  ;;  %v844_v6 = vld [vmem:[%s1162_s2 + $0x58] sm:$0xff]   ;;  %v846_v8 = vld [vmem:[%s1162_s2 + $0x60] sm:$0xff]   ;;  %v848_v10 = vld [vmem:[%s1162_s2 + $0x68] sm:$0xff]  }
   0x4   :  { %711 = vmatprep.subr.bf16.mxu0 %v840_v2  ;;  %v845_v7 = vld [vmem:[%s1162_s2 + $0x18] sm:$0xff]   ;;  %v847_v9 = vld [vmem:[%s1162_s2 + $0x20] sm:$0xff]   ;;  %v849_v12 = vld [vmem:[%s1162_s2 + $0x28] sm:$0xff]  }
   0x5   :  { %v856_v11 = vld [vmem:[%s1160_s0 + $0x4] ss:$8 sps:$4 sm:$0xff]   ;;  %v850_v13 = vld [vmem:[%s1162_s2 + $0x70] sm:$0xff]   ;;  %v852_v15 = vld [vmem:[%s1162_s2 + $0x78] sm:$0xff]  }
   0x6   :  { %233 = vmatprep.mubr.bf16.mxu0 %v856_v11  ;;  %v851_v14 = vld [vmem:[%s1162_s2 + $0x30] sm:$0xff]   ;;  %v853_v16 = vld [vmem:[%s1162_s2 + $0x38] sm:$0xff]   ;;  %v854_v17 = vld [vmem:[%s1160_s0] ss:$8 sps:$4 sm:$0xff]  }
   0x7   :  { %712 = vmatpush3.bf16.msra.mxu0 %v841_v3  ;;  %v857_v18 = vld [vmem:[%s1160_s0 + $0x14] ss:$8 sps:$4 sm:$0xff]  }
   0x8   :  { %713 = vmatprep.subr.bf16.mxu0 %v842_v4 }
   0xb   :  { %714 = vmatpush3.bf16.msra.mxu0 %v843_v5 }
   0xc   :  { %715 = vmatprep.subr.bf16.mxu0 %v844_v6 }
   0xf   :  { %716 = vmatpush3.bf16.msra.mxu0 %v845_v7 }
  0x10   :  { %717 = vmatprep.subr.bf16.mxu0 %v846_v8 }
  0x13   :  { %718 = vmatpush3.bf16.msra.mxu0 %v847_v9 }
  0x14   :  { %719 = vmatprep.subr.bf16.mxu0 %v848_v10 }
  0x17   :  { %720 = vmatpush3.bf16.msra.mxu0 %v849_v12 }
  0x18   :  { %721 = vmatprep.subr.bf16.mxu0 %v850_v13 }
  0x1b   :  { %722 = vmatpush3.bf16.msra.mxu0 %v851_v14 }
  0x1c   :  { %723 = vmatprep.subr.bf16.mxu0 %v852_v15 }
  0x1f   :  { %724 = vmatpush3.bf16.msra.mxu0 %v853_v16 }
  0x22   :  { %234 = vmatmul.mubr.bf16.vlgmr.msra.gmra.mrb[0].mxu0 %v854_v17 }
  0x23   :  { %15 = vsyncpa [#allocation4], 0  ;;  %241 = vmatprep.mubr.bf16.mxu0 %v857_v18  ;;  %v859_v19 = vld [vmem:[%s1160_s0 + $0x10] ss:$8 sps:$4 sm:$0xff]   ;;  %v908_v20 = vmov 0.0   ;;  %vm909_vm0 = vmmov 0  }
  0x24   :  { %767 = vmatprep.subr.bf16.mxu1 %v908_v20  ;;  %41 = vst [vmem:[#allocation2] sm:$0x3] %v908_v20  ;;  %795 = vmatprep.subr.bf16.mxu0 %v908_v20  ;;  %v660_v22 = vld [vmem:[%s1163_s3] ss:$0 sm:$0xff]  ;;  %vm258_vm1 = vcmask 261120   ;;  %v861_v46 = vld [vmem:[%s1164_s4 + $0x8] sm:$0xff]  }
  0x25   :  { %771 = vmatprep.mubr.msk.bf16.mxu1 %vm909_vm0, %v908_v20  ;;  %v255_v44 = vld [vmem:[%s1161_s1] sm:$0x1]  ;;  %v862_v47 = vld [vmem:[%s1164_s4 + $0x10] sm:$0xff]   ;;  %v863_v48 = vld [vmem:[%s1164_s4 + $0x18] sm:$0xff]   ;;  %s910_s16 = smov [#allocation3]  }
  0x26   :  { %v860_v45 = vld [vmem:[%s1164_s4] sm:$0xff]   ;;  %v865_v50 = vld [vmem:[%s1164_s4 + $0x28] sm:$0xff]   ;;  %v866_v51 = vld [vmem:[%s1164_s4 + $0x30] sm:$0xff]   ;;  %s652_s17 = sshll.u32 %s910_s16, 4  ;;  %s653_s17 = int_to_ptr.vmem [resolvable:$true] %s652_s17 }
  0x27   :  { %v864_v49 = vld [vmem:[%s1164_s4 + $0x20] sm:$0xff]   ;;  %v867_v52 = vld [vmem:[%s1164_s4 + $0x38] sm:$0xff]   ;;  %v869_v54 = vld [vmem:[%s1166_s6 + $0x8] sm:$0xff]   ;;  %p889_p1 = scmp.lt.s32.totalorder %s653_s17, %s653_s17 }
  0x28   :  { %v868_v53 = vld [vmem:[%s1166_s6] sm:$0xff]   ;;  %v870_v55 = vld [vmem:[%s1166_s6 + $0x10] sm:$0xff]   ;;  %v871_v56 = vld [vmem:[%s1166_s6 + $0x18] sm:$0xff]  }
  0x29   :  { %796 = vmatpush3.bf16.msra.mxu0 %v868_v53  ;;  %v872_v57 = vld [vmem:[%s1166_s6 + $0x20] sm:$0xff]   ;;  %v873_v58 = vld [vmem:[%s1166_s6 + $0x28] sm:$0xff]   ;;  %v874_v59 = vld [vmem:[%s1166_s6 + $0x30] sm:$0xff]  }
  0x2a   :  { %242 = vmatmul.mubr.bf16.gmra.mrb[4].mxu0 %v859_v19  ;;  %797 = vmatprep.subr.bf16.mxu0 %v908_v20  ;;  %v875_v4 = vld [vmem:[%s1166_s6 + $0x38] sm:$0xff]   ;;  %v876_v5 = vld [vmem:[%s1168_s8] sm:$0xff]   ;;  %v877_v6 = vld [vmem:[%s1168_s8 + $0x8] sm:$0xff]  }
  0x2b   :  { %811 = vmatprep.mubr.msk.bf16.mxu0 %vm909_vm0, %v908_v20  ;;  %v254_v60 = vld [vmem:[#allocation2] sm:$0x3]  ;;  %v878_v7 = vld [vmem:[%s1168_s8 + $0x10] sm:$0xff]   ;;  %v879_v8 = vld [vmem:[%s1168_s8 + $0x18] sm:$0xff]  }
  0x2c   :  { %v880_v9 = vld [vmem:[%s1168_s8 + $0x20] sm:$0xff]   ;;  %v881_v10 = vld [vmem:[%s1168_s8 + $0x28] sm:$0xff]   ;;  %v882_v18 = vld [vmem:[%s1168_s8 + $0x30] sm:$0xff]  }
  0x2d   :  { %798 = vmatpush3.bf16.msra.mxu0 %v869_v54  ;;  %v682_v11 = vld [vmem:[%s1165_s5] ss:$0 sm:$0xff]  ;;  %v883_v19 = vld [vmem:[%s1168_s8 + $0x38] sm:$0xff]  }
  0x2e   :  { %799 = vmatprep.subr.bf16.mxu0 %v908_v20 }
  0x31   :  { %800 = vmatpush3.bf16.msra.mxu0 %v870_v55 }
  0x32   :  { %801 = vmatprep.subr.bf16.mxu0 %v908_v20 }
  0x35   :  { %802 = vmatpush3.bf16.msra.mxu0 %v871_v56 }
  0x36   :  { %803 = vmatprep.subr.bf16.mxu0 %v908_v20 }
  0x39   :  { %804 = vmatpush3.bf16.msra.mxu0 %v872_v57 }
  0x3a   :  { %805 = vmatprep.subr.bf16.mxu0 %v908_v20 }
  0x3d   :  { %806 = vmatpush3.bf16.msra.mxu0 %v873_v58 }
  0x3e   :  { %807 = vmatprep.subr.bf16.mxu0 %v908_v20 }
  0x41   :  { %808 = vmatpush3.bf16.msra.mxu0 %v874_v59 }
  0x42   :  { %809 = vmatprep.subr.bf16.mxu0 %v908_v20 }
  0x45   :  { %810 = vmatpush3.bf16.msra.mxu0 %v875_v4 }
  0xf5   :  { %v725_v21 = vpop.f32.mrb[0].mxu0 }
  0xf6   :  { %v726_v23 = vpop.f32.mrb[1].mxu0 }
  0xf7   :  { %v727_v24 = vadd.f32 %v726_v23, %v725_v21  ;;  %v728_v25 = vpop.f32.mrb[2].mxu0  ;;  %v691_v21 = vld [vmem:[%s1167_s7] ss:$0 sm:$0xff]  ;;  %s884_s7 = scalar_lea.vmem %s653_s17, 32 }
  0xf8   :  { %v729_v26 = vpop.f32.mrb[3].mxu0  ;;  %p885_p0 = scmp.ne.s32.totalorder %s653_s17, %s884_s7  ;;  %p890_p2 = scmp.lt.s32.totalorder %s884_s7, %s884_s7 }
  0xf9   :  { %v236_v27 = vadd.f32 %v727_v24, %v660_v22  ;;  %v730_v28 = vadd.f32 %v729_v26, %v728_v25 }
  0xfa   :  { %p891_p3 = por %p890_p2, %p889_p1 }
  0xfb   :  { %v239_v29 = vadd.f32 %v730_v28, %v660_v22  ;;  %v250_v30 = vmax.f32 %v236_v27, 0.0 }
  0xfc   :  { %p892_p4 = pnand %p891_p3, %p885_p0 }
  0xfd   :  { %v251_v31 = vmax.f32 %v239_v29, 0.0  ;;  %v731_v32 = vpop.f32.mrb[4].mxu0 }
  0xfe   :  { %v732_v33 = vpop.f32.mrb[5].mxu0 }
  0xff   :  { %v733_v34 = vadd.f32 %v732_v33, %v731_v32  ;;  %v734_v35 = vpop.f32.mrb[6].mxu0  ;;  %v256_v36 = vpack.c.bf16 %v251_v31, %v250_v30 }
 0x100   :  { %v735_v37 = vpop.f32.mrb[7].mxu0 }
 0x101   :  { %v244_v38 = vadd.f32 %v733_v34, %v660_v22  ;;  %v736_v39 = vadd.f32 %v735_v37, %v734_v35  ;;  %768 = vmatpush3.bf16.msra.mxu1 %v256_v36 }
 0x102   :  { %769 = vmatprep.subr.bf16.mxu1 %v908_v20 }
 0x103   :  { %v247_v40 = vadd.f32 %v736_v39, %v660_v22  ;;  %v252_v41 = vmax.f32 %v244_v38, 0.0 }
 0x105   :  { %v253_v42 = vmax.f32 %v247_v40, 0.0 }
 0x107   :  { %v257_v43 = vpack.c.bf16 %v253_v42, %v252_v41 }
 0x109   :  { %770 = vmatpush3.bf16.msra.mxu1 %v257_v43 }
 0x10a   :  { %775 = vmatprep.subr.bf16.mxu1 %v908_v20 }
 0x10c   :  { %772 = vmatmul.mubr.msk.bf16.vlgmr.msra.gmra.mrb[0].mxu1 %vm258_vm1, %v255_v44 }
 0x10d   :  { %776 = vmatpush3.bf16.msra.mxu1 %v860_v45  ;;  %791 = vmatprep.mubr.msk.bf16.mxu1 %vm909_vm0, %v908_v20 }
 0x10e   :  { %777 = vmatprep.subr.bf16.mxu1 %v908_v20 }
 0x111   :  { %778 = vmatpush3.bf16.msra.mxu1 %v861_v46 }
 0x112   :  { %779 = vmatprep.subr.bf16.mxu1 %v908_v20 }
 0x115   :  { %780 = vmatpush3.bf16.msra.mxu1 %v862_v47 }
 0x116   :  { %781 = vmatprep.subr.bf16.mxu1 %v908_v20 }
 0x119   :  { %782 = vmatpush3.bf16.msra.mxu1 %v863_v48 }
 0x11a   :  { %783 = vmatprep.subr.bf16.mxu1 %v908_v20 }
 0x11d   :  { %784 = vmatpush3.bf16.msra.mxu1 %v864_v49 }
 0x11e   :  { %785 = vmatprep.subr.bf16.mxu1 %v908_v20 }
 0x121   :  { %786 = vmatpush3.bf16.msra.mxu1 %v865_v50 }
 0x122   :  { %787 = vmatprep.subr.bf16.mxu1 %v908_v20 }
 0x125   :  { %788 = vmatpush3.bf16.msra.mxu1 %v866_v51 }
 0x126   :  { %789 = vmatprep.subr.bf16.mxu1 %v908_v20 }
 0x129   :  { %790 = vmatpush3.bf16.msra.mxu1 %v867_v52 }
 0x12a   :  { %815 = vmatprep.subr.bf16.mxu1 %v908_v20 }
 0x1df   :  { %v296_v61 = vpop.f32.mrb[0].mxu1 }
 0x1e0   :  { %v302_v62 = vadd.f32 %v296_v61, %v254_v60  ;;  %v773_v63 = vpop.f32.mrb[1].mxu1 }
 0x1e1   :  { %v299_v0 = vpop.f32.mrb[2].mxu1 }
 0x1e2   :  { %303 = vst [vmem:[#allocation2] sm:$0x3] %v302_v62  ;;  %v774_v1 = vpop.f32.mrb[3].mxu1 }
 0x1e9   :  { %v307_v2 = vld [vmem:[#allocation2] sm:$0x3] }
 0x1ea   :  { %v308_v3 = vpack.c.bf16 %v307_v2, %v307_v2 }
 0x1ec   :  { %792 = vmatmul.mubr.bf16.vlgmr.msra.gmra.mrb[4].mxu1 %v308_v3 }
 0x1ed   :  { %831 = vmatprep.mubr.msk.bf16.mxu1 %vm909_vm0, %v908_v20  ;;  %816 = vmatpush3.bf16.msra.mxu1 %v876_v5 }
 0x1ee   :  { %817 = vmatprep.subr.bf16.mxu1 %v908_v20 }
 0x1f1   :  { %818 = vmatpush3.bf16.msra.mxu1 %v877_v6 }
 0x1f2   :  { %819 = vmatprep.subr.bf16.mxu1 %v908_v20 }
 0x1f5   :  { %820 = vmatpush3.bf16.msra.mxu1 %v878_v7 }
 0x1f6   :  { %821 = vmatprep.subr.bf16.mxu1 %v908_v20 }
 0x1f9   :  { %822 = vmatpush3.bf16.msra.mxu1 %v879_v8 }
 0x1fa   :  { %823 = vmatprep.subr.bf16.mxu1 %v908_v20 }
 0x1fd   :  { %824 = vmatpush3.bf16.msra.mxu1 %v880_v9 }
 0x1fe   :  { %825 = vmatprep.subr.bf16.mxu1 %v908_v20 }
 0x201   :  { %826 = vmatpush3.bf16.msra.mxu1 %v881_v10 }
 0x202   :  { %827 = vmatprep.subr.bf16.mxu1 %v908_v20 }
 0x205   :  { %828 = vmatpush3.bf16.msra.mxu1 %v882_v18 }
 0x206   :  { %829 = vmatprep.subr.bf16.mxu1 %v908_v20  ;;  %v700_v20 = vld [vmem:[%s1169_s9] ss:$0 sm:$0xff] }
 0x209   :  { %830 = vmatpush3.bf16.msra.mxu1 %v883_v19 }
 0x2bf   :  { %v414_v12 = vpop.f32.mrb[4].mxu1 }
 0x2c0   :  { %v415_v13 = vadd.f32 %v682_v11, %v414_v12  ;;  %v793_v14 = vpop.f32.mrb[5].mxu1 }
 0x2c1   :  { %v417_v15 = vpop.f32.mrb[6].mxu1 }
 0x2c2   :  { %v420_v16 = vpack.c.bf16 %v415_v13, %v415_v13  ;;  %v794_v17 = vpop.f32.mrb[7].mxu1 }
 0x2c4   :  { %812 = vmatmul.mubr.bf16.vlgmr.msra.gmra.mrb[8].mxu0 %v420_v16 }
 0x397   :  { %v526_v22 = vpop.f32.mrb[8].mxu0 }
 0x398   :  { %v527_v23 = vadd.f32 %v691_v21, %v526_v22  ;;  %v813_v24 = vpop.f32.mrb[9].mxu0 }
 0x399   :  { %v529_v25 = vpop.f32.mrb[10].mxu0 }
 0x39a   :  { %v532_v26 = vmax.f32 %v527_v23, 0.0  ;;  %v814_v27 = vpop.f32.mrb[11].mxu0 }
 0x39c   :  { %v533_v28 = vpack.c.bf16 %v532_v26, %v532_v26 }
 0x39e   :  { %832 = vmatmul.mubr.bf16.vlgmr.msra.gmra.mrb[8].mxu1 %v533_v28 }
 0x471   :  { %v639_v29 = vpop.f32.mrb[8].mxu1 }
 0x472   :  { %v640_v30 = vadd.f32 %v700_v20, %v639_v29  ;;  %v833_v31 = vpop.f32.mrb[9].mxu1 }
 0x473   :  { %v642_v32 = vpop.f32.mrb[10].mxu1 }
 0x474   :  { %645 = vst [vmem:[#allocation3] sm:$0x3] %v640_v30  ;;  %v834_v33 = vpop.f32.mrb[11].mxu1 }
 0x475   :  { %895 = shalt.err (!%p892_p4)
}
 0x476   :  { %s896_s9 = scalar_lea.hbm %s1170_s10, 32 }
 0x477   :  { %p897_p5 = scmp.ne.s32.totalorder %s1170_s10, %s896_s9  ;;  %p900_p6 = scmp.lt.u32.totalorder %s896_s9, %s1170_s10 }
 0x479   :  { %p902_p7 = pnand %p900_p6, %p897_p5 }
 0x47b   :  { %905 = shalt.err (!%p902_p7)
}
 0x47c   :  { %655 = dma.vmem_to_hbm [thread:$0]  %s653_s17, 32, %s1170_s10, [#allocation4]  }
 0x47d   :  { %906 = dma.done.wait [#allocation4], 32  }
 0x47e   :  { %907 = vsyncadd [#allocation4], 4294967264 }
 0x47f   :  { %659 = vsyncpa [#allocation4], 1 }

</bundles_post_ra>
